<compile_context>
chip_gen: v5e
topology: v5e:2x2
jax: 0.10.0
libtpu: 0.0.40
codegen_flags: <defaults>
</compile_context>

<pallas_src>
import functools

import jax
import jax.numpy as jnp
from jax.experimental import pallas as pl
from jax.experimental.pallas import tpu as pltpu


def _channel_pool_kernel(x_ref, out_ref, sum_acc, max_acc, *,
                         hw, hw_tile, need_mask):
    s = pl.program_id(1)
    n_s = pl.num_programs(1)

    @pl.when(s == 0)
    def _init():
        sum_acc[...] = jnp.zeros_like(sum_acc)
        max_acc[...] = jnp.full_like(max_acc, -jnp.inf)

    xt = x_ref[...]                                   # (1, C, hw_tile), native dtype

    def _accumulate(x_for_max):
        # Sum is widened to f32 by the reduction (no-op for f32 inputs);
        # max stays in the native dtype, only the tiny (1, C) per-tile
        # result is cast when merged into the f32 scratch.
        sum_acc[...] += jnp.sum(xt, axis=-1, dtype=jnp.float32)
        tile_max = jnp.max(x_for_max, axis=-1)
        max_acc[...] = jnp.maximum(max_acc[...], tile_max.astype(jnp.float32))

    if need_mask:
        # Wrapper zero-pads, so the sum is exact without any mask.  Padding
        # only lives in the final spatial tile, so the -inf mask for the max
        # path is applied there only.
        is_last = s == n_s - 1

        @pl.when(jnp.logical_not(is_last))
        def _plain():
            _accumulate(xt)

        @pl.when(is_last)
        def _masked():
            col = s * hw_tile + jax.lax.broadcasted_iota(jnp.int32, xt.shape, 2)
            neg = jnp.asarray(-jnp.inf, dtype=xt.dtype)
            _accumulate(jnp.where(col < hw, xt, neg))
    else:
        _accumulate(xt)

    @pl.when(s == n_s - 1)
    def _finalize():
        avg = sum_acc[...] * jnp.float32(1.0 / hw)            # (1, C)
        pooled = jnp.concatenate([avg, max_acc[...]], axis=0)  # (2, C)
        out_ref[...] = pooled[None].astype(out_ref.dtype)      # (1, 2, C)


def _vmem_capacity_bytes():
    try:
        info = pltpu.get_tpu_info()
        cap = getattr(info, "vmem_capacity_bytes", None)
        if cap:
            return int(cap)
    except Exception:
        pass
    return 64 * 1024 * 1024  # conservative default (v7x per-core VMEM)


def _pick_hw_tile(C, HW, itemsize, vmem_cap):
    """Largest 128-multiple spatial tile under a generation-aware byte budget.

    ~1/10 of physical VMEM per input buffer (two double-buffered copies plus
    f32 widening temporaries stay well under half of VMEM): ≈6 MiB/buffer on
    v7x (64 MiB), ≈12 MiB/buffer on v5e/v6e (128 MiB).  No artificial lane cap.
    """
    hw_pad128 = pl.cdiv(HW, 128) * 128
    budget = vmem_cap // 10
    tile = (budget // max(1, C * itemsize)) // 128 * 128
    return max(128, min(hw_pad128, tile))


def channel_attention(x, w1, b1, w2, b2, *, hw_tile=None):
    """x: (B, C, H, W) NCHW.  Returns (B, outc, 1, 1) like the PyTorch module."""
    B, C, H, W = x.shape
    HW = H * W
    outc = w2.shape[1]
    itemsize = jnp.dtype(x.dtype).itemsize
    vmem_cap = _vmem_capacity_bytes()

    if hw_tile is None:
        hw_tile = _pick_hw_tile(C, HW, itemsize, vmem_cap)
    else:
        hw_tile = max(128, pl.cdiv(hw_tile, 128) * 128)

    n_s = pl.cdiv(HW, hw_tile)
    hw_pad = n_s * hw_tile

    x_flat = x.reshape(B, C, HW)
    if hw_pad != HW:
        x_flat = jnp.pad(x_flat, ((0, 0), (0, 0), (0, hw_pad - HW)))

    kernel = functools.partial(
        _channel_pool_kernel,
        hw=HW, hw_tile=hw_tile, need_mask=(hw_pad != HW),
    )

    # Explicit scoped-VMEM limit: 2 double-buffered input tiles + headroom
    # for f32 widening temporaries (matters for sub-f32 inputs) + margin.
    x_buf_bytes = C * hw_tile * itemsize
    vmem_need = 2 * x_buf_bytes + 2 * C * hw_tile * 4 + (4 << 20)
    vmem_limit = int(min(vmem_cap, max(vmem_need, 16 << 20)))

    cost = pl.CostEstimate(
        flops=2 * B * C * HW,
        transcendentals=0,
        bytes_accessed=B * C * hw_pad * itemsize + B * 2 * C * 4,
    )

    pooled = pl.pallas_call(
        kernel,
        out_shape=jax.ShapeDtypeStruct((B, 2, C), jnp.float32),
        grid_spec=pltpu.PrefetchScalarGridSpec(
            num_scalar_prefetch=0,
            grid=(B, n_s),
            in_specs=[
                # x: streamed spatial tiles, double-buffered by Pallas.
                pl.BlockSpec((1, C, hw_tile), lambda b, s: (b, 0, s)),
            ],
            out_specs=pl.BlockSpec((1, 2, C), lambda b, s: (b, 0, 0)),
            scratch_shapes=[
                pltpu.VMEM((1, C), jnp.float32),  # running sum (f32)
                pltpu.VMEM((1, C), jnp.float32),  # running max (f32)
            ],
        ),
        compiler_params=pltpu.CompilerParams(
            dimension_semantics=("parallel", "arbitrary"),
            vmem_limit_bytes=vmem_limit,
        ),
        cost_estimate=cost,
    )(x_flat)

    # Shared MLP (avg path + max path) + sigmoid, batched into one MXU-shaped
    # matmul over all B*2 pooled vectors in plain JAX (f32).
    flat = pooled.reshape(B * 2, C)
    h = jnp.maximum(flat @ w1.astype(jnp.float32) + b1.astype(jnp.float32), 0.0)
    o = (h @ w2.astype(jnp.float32) + b2.astype(jnp.float32)).reshape(B, 2, outc)
    out = jax.nn.sigmoid(o[:, 0, :] + o[:, 1, :])
    return out.astype(x.dtype).reshape(B, outc, 1, 1)


def init_params(key, in_planes, outc, ratio):
    """Deterministic synthetic weights (nn.Linear shapes, stored as (in, out))."""
    hidden = in_planes // ratio
    k1, k2, k3, k4 = jax.random.split(key, 4)
    w1 = jax.random.normal(k1, (in_planes, hidden), jnp.float32) * 0.1
    b1 = jax.random.normal(k2, (hidden,), jnp.float32) * 0.1
    w2 = jax.random.normal(k3, (hidden, outc), jnp.float32) * 0.1
    b2 = jax.random.normal(k4, (outc,), jnp.float32) * 0.1
    return w1, b1, w2, b2


if __name__ == "__main__":
    B, C, H, W = 2, 4, 16, 16
    ratio, outc = 2, 4

    key = jax.random.PRNGKey(0)
    kx, kp, kx2 = jax.random.split(key, 3)
    x = jax.random.normal(kx, (B, C, H, W), jnp.float32)
    w1, b1, w2, b2 = init_params(kp, C, outc, ratio)

    def reference(xr):
        b, c = xr.shape[:2]
        avg = jnp.mean(xr.reshape(b, c, -1), axis=-1)
        mx = jnp.max(xr.reshape(b, c, -1), axis=-1)
        fc = lambda v: jnp.maximum(v @ w1 + b1, 0.0) @ w2 + b2
        return jax.nn.sigmoid(fc(avg) + fc(mx)).reshape(b, outc, 1, 1)

    out = jax.block_until_ready(channel_attention(x, w1, b1, w2, b2))
    ref = reference(x)
    assert out.shape == (B, outc, 1, 1)
    assert jnp.allclose(out, ref, atol=1e-5), "mismatch vs reference"

    # Exercise the multi-tile streaming path and the ragged-tile -inf max mask
    # (mostly-negative values so zero padding would corrupt an unmasked max).
    x2 = jax.random.normal(kx2, (1, C, 15, 23), jnp.float32) - 1.0
    out2 = jax.block_until_ready(
        channel_attention(x2, w1, b1, w2, b2, hw_tile=128))
    ref2 = reference(x2)
    assert jnp.allclose(out2, ref2, atol=1e-5), "mismatch vs reference (ragged)"

    print("KERNEL_OK")
</pallas_src>

<mosaic_0001>
module attributes {stable_mosaic.version = 11 : i64} {
  func.func @_channel_pool_kernel(%arg0: i32, %arg1: i32, %arg2: memref<1x4x256xf32, #tpu.memory_space<vmem>>, %arg3: memref<1x2x4xf32, #tpu.memory_space<vmem>>, %arg4: memref<1x4xf32, #tpu.memory_space<vmem>>, %arg5: memref<1x4xf32, #tpu.memory_space<vmem>>) attributes {dimension_semantics = [#tpu.dimension_semantics<parallel>, #tpu.dimension_semantics<arbitrary>], iteration_bounds = array<i64: 2, 1>, scalar_prefetch = 0 : i64, scratch_operands = 2 : i64, tpu.core_type = #tpu.core_type<tc>, window_params = [{transform_indices = @transform_0, window_bounds = array<i64: 1, 4, 256>}, {transform_indices = @transform_1, window_bounds = array<i64: 1, 2, 4>}]} {
    %c0_i32 = arith.constant 0 : i32
    %0 = arith.cmpi eq, %arg1, %c0_i32 : i32
    %1 = arith.extui %0 : i1 to i32
    %c0_i32_0 = arith.constant 0 : i32
    %2 = arith.cmpi ne, %1, %c0_i32_0 : i32
    scf.if %2 {
      %cst_14 = arith.constant 0.000000e+00 : f32
      %15 = vector.broadcast %cst_14 : f32 to vector<1x4xf32>
      %c0_15 = arith.constant 0 : index
      %c0_16 = arith.constant 0 : index
      %16 = vector.load %arg4[%c0_15, %c0_16] : memref<1x4xf32, #tpu.memory_space<vmem>>, vector<1x4xf32>
      tpu.vector_store %arg4[%c0_15, %c0_16], %15 {strides = array<i32>} : memref<1x4xf32, #tpu.memory_space<vmem>>, vector<1x4xf32>,
      %cst_17 = arith.constant 0xFF800000 : f32
      %17 = vector.broadcast %cst_17 : f32 to vector<1x4xf32>
      %c0_18 = arith.constant 0 : index
      %c0_19 = arith.constant 0 : index
      %18 = vector.load %arg5[%c0_18, %c0_19] : memref<1x4xf32, #tpu.memory_space<vmem>>, vector<1x4xf32>
      tpu.vector_store %arg5[%c0_18, %c0_19], %17 {strides = array<i32>} : memref<1x4xf32, #tpu.memory_space<vmem>>, vector<1x4xf32>,
    } else {
    }
    %c0 = arith.constant 0 : index
    %c0_1 = arith.constant 0 : index
    %c0_2 = arith.constant 0 : index
    %3 = vector.load %arg2[%c0, %c0_1, %c0_2] : memref<1x4x256xf32, #tpu.memory_space<vmem>>, vector<1x4x256xf32>
    %c0_3 = arith.constant 0 : index
    %c0_4 = arith.constant 0 : index
    %4 = vector.load %arg4[%c0_3, %c0_4] : memref<1x4xf32, #tpu.memory_space<vmem>>, vector<1x4xf32>
    %cst = arith.constant dense<0.000000e+00> : vector<1x4xf32>
    %5 = vector.multi_reduction <add>, %3, %cst [2] : vector<1x4x256xf32> to vector<1x4xf32>
    %6 = arith.addf %4, %5 : vector<1x4xf32>
    %c0_5 = arith.constant 0 : index
    %c0_6 = arith.constant 0 : index
    %7 = vector.load %arg4[%c0_5, %c0_6] : memref<1x4xf32, #tpu.memory_space<vmem>>, vector<1x4xf32>
    tpu.vector_store %arg4[%c0_5, %c0_6], %6 {strides = array<i32>} : memref<1x4xf32, #tpu.memory_space<vmem>>, vector<1x4xf32>,
    %cst_7 = arith.constant dense<0xFF800000> : vector<1x4xf32>
    %8 = vector.multi_reduction <maximumf>, %3, %cst_7 [2] : vector<1x4x256xf32> to vector<1x4xf32>
    %c0_8 = arith.constant 0 : index
    %c0_9 = arith.constant 0 : index
    %9 = vector.load %arg5[%c0_8, %c0_9] : memref<1x4xf32, #tpu.memory_space<vmem>>, vector<1x4xf32>
    %10 = arith.maximumf %9, %8 : vector<1x4xf32>
    %c0_10 = arith.constant 0 : index
    %c0_11 = arith.constant 0 : index
    %11 = vector.load %arg5[%c0_10, %c0_11] : memref<1x4xf32, #tpu.memory_space<vmem>>, vector<1x4xf32>
    tpu.vector_store %arg5[%c0_10, %c0_11], %10 {strides = array<i32>} : memref<1x4xf32, #tpu.memory_space<vmem>>, vector<1x4xf32>,
    %c0_i32_12 = arith.constant 0 : i32
    %12 = arith.cmpi eq, %arg1, %c0_i32_12 : i32
    %13 = arith.extui %12 : i1 to i32
    %c0_i32_13 = arith.constant 0 : i32
    %14 = arith.cmpi ne, %13, %c0_i32_13 : i32
    scf.if %14 {
      %c0_14 = arith.constant 0 : index
      %c0_15 = arith.constant 0 : index
      %15 = vector.load %arg4[%c0_14, %c0_15] : memref<1x4xf32, #tpu.memory_space<vmem>>, vector<1x4xf32>
      %cst_16 = arith.constant 3.906250e-03 : f32
      %16 = vector.broadcast %cst_16 : f32 to vector<1x4xf32>
      %17 = arith.mulf %15, %16 : vector<1x4xf32>
      %c0_17 = arith.constant 0 : index
      %c0_18 = arith.constant 0 : index
      %18 = vector.load %arg5[%c0_17, %c0_18] : memref<1x4xf32, #tpu.memory_space<vmem>>, vector<1x4xf32>
      %19 = tpu.concatenate %17, %18 in 0 : vector<1x4xf32>, vector<1x4xf32> -> vector<2x4xf32>
      %20 = vector.shape_cast %19 : vector<2x4xf32> to vector<1x2x4xf32>
      %c0_19 = arith.constant 0 : index
      %c0_20 = arith.constant 0 : index
      %c0_21 = arith.constant 0 : index
      %21 = vector.load %arg3[%c0_19, %c0_20, %c0_21] : memref<1x2x4xf32, #tpu.memory_space<vmem>>, vector<1x2x4xf32>
      tpu.vector_store %arg3[%c0_19, %c0_20, %c0_21], %20 {strides = array<i32>} : memref<1x2x4xf32, #tpu.memory_space<vmem>>, vector<1x2x4xf32>,
    } else {
    }
    return
  }
  func.func @transform_0(%arg0: i32, %arg1: i32) -> (i32, i32, i32) {
    %c0_i32 = arith.constant 0 : i32
    %c0_i32_0 = arith.constant 0 : i32
    return %arg0, %c0_i32, %arg1 : i32, i32, i32
  }
  func.func @transform_1(%arg0: i32, %arg1: i32) -> (i32, i32, i32) {
    %c0_i32 = arith.constant 0 : i32
    %c0_i32_0 = arith.constant 0 : i32
    %c0_i32_1 = arith.constant 0 : i32
    return %arg0, %c0_i32, %c0_i32_0 : i32, i32, i32
  }
}

</mosaic_0001>

<bundles_post_ra>
// kernel: tpu_custom_call.1
= control target key start
LH: loop header
LB: loop body
LE: loop exit
PB: predicated region body
PF: predicated region fallthrough
CT: control target
= control target key end

     0   :  { %6 = vsyncpa [#allocation5], 0  ;;  %s676_s0 = inlined_call_operand.hbm [shape: f32[2,4,256], index: 0, kind: input, shape index: {}]   ;;  %s677_s1 = inlined_call_operand.hbm [shape: f32[2,2,4], index: 1, kind: output, shape index: {}]  }
   0x1   :  { %8 = vsyncpa [#allocation5 + $0x1], 0 }
   0x2   :  { %9 = vsyncpa [#allocation6], 0 }
   0x3   :  { %11 = vsyncpa [#allocation6 + $0x1], 0  ;;  %s547_s6 = smov 0   ;;  %s549_s7 = smov 0  }
   0x4   :  { %s551_s8 = smov 0   ;;  %s553_s9 = smov 0  }
   0x5   :  { %s555_s10 = smov 0   ;;  %s557_s11 = smov 0  }
   0x6 LB: > { %s337_s12 = sadd.s32 4294967295, %s532_s11   ;;  %s338_s13 = sadd.s32 4294967294, %s532_s11   ;;  %s532_s11 = sphi %s557_s11, %s17_s11   ;;  %s528_s10 = sphi %s555_s10, %s686_s10   ;;  %s524_s9 = sphi %s553_s9, %s685_s9   ;;  %s520_s8 = sphi %s551_s8, %s684_s8   ;;  %s516_s7 = sphi %s549_s7, %s683_s7   ;;  %s512_s6 = sphi %s547_s6, %s682_s6  }
   0x7   : > { %s29_s14 = sadd.s32 1, %s528_s10  ;;  %s38_s15 = sadd.s32 1, %s520_s8 }
   0x8   : > { %p31_p0 = scmp.ge.s32.totalorder %s29_s14, 2  ;;  %p45_p1 = scmp.ne.s32.totalorder %s520_s8, %s516_s7 }
   0x9   : > { %p46_p2 = scmp.eq.s32.totalorder %s532_s11, 0  ;;  %p51_p3 = scmp.ne.s32.totalorder %s516_s7, %s512_s6 }
   0xa   : > { %s688_s14 = smov (%p31_p0, %s29_s14), 0  ;;  %p52_p5 = scmp.eq.s32.totalorder %s337_s12, 0 }
   0xb   : > { %p588_p4 = por %p46_p2, %p45_p1  ;;  %s33_s17 = ssub.s32 %s528_s10, %s688_s14 }
   0xc   : > { %p75_p6 = scmp.eq.s32.totalorder %s337_s12, 1  ;;  %p36_p7 = scmp.eq.s32.totalorder %s33_s17, 0 }
   0xd   : > { %p594_p8 = por %p52_p5, %p51_p3  ;;  %p81_p10 = scmp.eq.s32.totalorder %s338_s13, 1 }
   0xe   : > { %p598_p9 = por %p75_p6, %p45_p1  ;;  %p340_p12 = scmp.ge.s32.totalorder %s532_s11, 2 }
   0xf   : > { %s603_s20 = scalar_select %p36_p7, %s520_s8, %s38_s15  }
  0x10   : > { %p605_p11 = por %p81_p10, %p51_p3  ;;  %p364_p13 = scmp.lt.s32.totalorder %s532_s11, 2 }
  0x11   : > { %s101_s22 = sand.u32 1, %s520_s8   ;;  %s351_s24 = sshll.u32 %s528_s10, 3 }
  0x12   : > { %s341_s23 = sshll.u32 %s101_s22, 3  ;;  %s112_s27 = scalar_lea.hbm %s676_s0, %s351_s24 }
  0x13   : > { %s105_s28 = scalar_lea.vmem [#allocation4], %s341_s23  ;;  %s114_s30 = sshll.u32 %s112_s27, 4  ;;  %s115_s30 = int_to_ptr.hbm [resolvable:$true] %s114_s30 }
  0x14   : > { %s116_s29 = sshll.u32 %s105_s28, 4  ;;  %p357_p0 = pnand %p364_p13, %p588_p4  ;;  %s117_s29 = int_to_ptr.vmem [resolvable:$true] %s116_s29 }
  0x15   : > { %p344_p1 = scmp.ge.s32.totalorder %s532_s11, 1  ;;  %p121_p2 = scmp.lt.s32.totalorder %s532_s11, 3 }
  0x16   : > { %s102_s2 = scalar_lea.sflag [#allocation5], %s101_s22 }
  0x17   : > { %359 = dma.hbm_to_vmem [thread:$0]  (!%p357_p0), %s115_s30, 128, %s117_s29, %s102_s2  }
  0x18   : > { %p122_p3 = pnand %p344_p1, %p121_p2 }
  0x19   : > { %s621_s3 = sand.u32 (!%p122_p3), 1, %s516_s7  }
  0x1a   : > { %125 = sbr.rel (%p122_p3) target bundleno = 444 (0x1bc), region = 24  ;;  %s345_s4 = sshll.u32 (!%p122_p3), %s621_s3, 3 }
  0x1b   : > { %s128_s5 = scalar_lea.sflag (!%p122_p3), [#allocation5], %s621_s3  ;;  %s131_s12 = scalar_lea.vmem (!%p122_p3), [#allocation4], %s345_s4 }
  0x1f   : > { %503 = dma.done.wait (%p594_p8), %s128_s5, 128  }
  0x20   : > { %505 = vsyncadd (%p594_p8), %s128_s5, 4294967168  ;;  %v159_v0 = vld [vmem:[%s131_s12] sm:$0xff]  ;;  %vm167_vm0 = vcmask 1043456   ;;  %v534_v6 = vmov 0   ;;  %vm156_vm1 = vcmask 24576   ;;  %v535_v7 = vmov 0.0  }
  0x21   : > { %162 = vst [vmem:[#allocation1] ss:$2 sm:$0xff] %v159_v0  ;;  %417 = vset.pattern.permute.xlu1 %v534_v6  ;;  %418 = vset.pattern.permute.xlu0 %v534_v6  ;;  %v189_v19 = vlaneseq  ;;  %v536_v20 = vmov -inf   ;;  %s346_s13 = sshll.u32 %s621_s3, 1  ;;  %s348_s15 = sshll.u32 %s524_s9, 1  ;;  %vm236_vm2 = vcmask 1040384  }
  0x22   : > { %157 = vst.msk [vmem:[#allocation2] sm:$0x1] %vm156_vm1, %v535_v7  ;;  %s251_s18 = scalar_lea.hbm %s677_s1, %s348_s15  ;;  %s150_s22 = scalar_lea.vmem [#allocation7], %s346_s13  ;;  %vm238_vm3 = vcmask 25600  }
  0x23   : > { %158 = vst.msk [vmem:[#allocation3] sm:$0x1] %vm156_vm1, %v536_v20  ;;  %v190_v21 = vand.u32 127, %v189_v19  ;;  %s253_s23 = sshll.u32 %s150_s22, 4  ;;  %s255_s24 = sshll.u32 %s251_s18, 4  ;;  %s254_s23 = int_to_ptr.vmem [resolvable:$true] %s253_s23  ;;  %s256_s24 = int_to_ptr.hbm [resolvable:$true] %s255_s24 }
  0x24   : > { %s241_s9 = scalar_lea.sflag [#allocation6], %s621_s3  ;;  %s464_s25 = sshra.s32 %s256_s24, 4  ;;  %s465_s25 = int_to_ptr.hbm [resolvable:$true] %s464_s25 }
  0x25   : > { %s466_s26 = scalar_lea.hbm %s465_s25, 2  ;;  %s470_s29 = scalar_lea.hbm %s677_s1, 4 }
  0x26   : > { %p467_p4 = scmp.ne.s32.totalorder %s465_s25, %s466_s26  ;;  %p471_p7 = scmp.lt.s32.totalorder %s465_s25, %s677_s1 }
  0x27   : > { %p472_p8 = scmp.lt.s32.totalorder %s470_s29, %s466_s26 }
  0x28   : > { %v163_v1 = vld.sshfl [vmem:[#allocation1] sm:$0xff pattern:$0x75316420]  ;;  %v164_v2 = vld.sshfl [vmem:[#allocation1 + $0x8] sm:$0xff pattern:$0x75316420]  ;;  %p468_p5 = pnand %p467_p4, %p598_p9 }
  0x29   : > { %v168_v3 = vsel %vm167_vm0, %v163_v1, 0.0  ;;  %v169_v4 = vsel %vm167_vm0, %v164_v2, 0.0  ;;  %v160_v23 = vld [vmem:[#allocation2] sm:$0x1]  ;;  %p473_p10 = por %p472_p8, %p471_p7 }
  0x2a   : > { %v170_v5 = vadd.f32 %v169_v4, %v168_v3  ;;  %v206_v33 = vld [vmem:[#allocation3] sm:$0x1]  ;;  %p469_p6 = pneg %p468_p5 }
  0x2c   : > { %171 = vadd.xlane.f32.xlu0 %v170_v5  ;;  %p474_p13 = pnand %p473_p10, %p469_p6 }
  0x9f   : > { %v172_v8 = vpop.xlane.xlu0 %171 }
  0xa0   : > { %v174_v9 = vperm.slane %v172_v8, 0  ;;  %v175_v10 = vperm.slane %v172_v8, 1  ;;  %v176_v11 = vperm.slane %v172_v8, 2  ;;  %v177_v12 = vperm.slane %v172_v8, 3 }
  0xa2   : > { %178 = vst [vmem:[#allocation1] ss:$9 sm:$0xff] %v174_v9 }
  0xa3   : > { %180 = vst [vmem:[#allocation1 + $0x1] ss:$9 sm:$0xff] %v175_v10 }
  0xa4   : > { %182 = vst [vmem:[#allocation1 + $0x2] ss:$9 sm:$0xff] %v176_v11 }
  0xa5   : > { %184 = vst [vmem:[#allocation1 + $0x3] ss:$9 sm:$0xff] %v177_v12 }
  0xac   : > { %v185_v13 = vld [vmem:[#allocation1] sm:$0xff] }
  0xad   : > { %187 = vperm.xlu1 %417, %v185_v13   ;;  %196 = vst [vmem:[#allocation1] ss:$2 sm:$0xff] %v159_v0 }
  0xb4   : > { %v197_v14 = vld.sshfl [vmem:[#allocation1] sm:$0xff pattern:$0x75316420]  ;;  %v198_v15 = vld.sshfl [vmem:[#allocation1 + $0x8] sm:$0xff pattern:$0x75316420] }
  0xb5   : > { %v201_v16 = vsel %vm167_vm0, %v197_v14, -inf  ;;  %v202_v17 = vsel %vm167_vm0, %v198_v15, -inf }
  0xb6   : > { %v203_v18 = vmax.f32 %v201_v16, %v202_v17 }
  0xb8   : > { %204 = vmax.xlane.f32.xlu0 %v203_v18 }
 0x11f   : > { %v188_v22 = vpop.permute.xlu1 %187 }
 0x120   : > { %v191_v24 = vperm.slane %v188_v22, %v190_v21 }
 0x122   : > { %v193_v25 = vadd.f32 %v191_v24, %v160_v23 }
 0x124   : > { %195 = vst.msk [vmem:[#allocation2] sm:$0x1] %vm156_vm1, %v193_v25 }
 0x12b   : > { %v205_v26 = vpop.xlane.xlu0 %204  ;;  %v230_v36 = vld [vmem:[#allocation2] sm:$0x1] }
 0x12c   : > { %v208_v27 = vperm.slane %v205_v26, 0  ;;  %v209_v28 = vperm.slane %v205_v26, 1  ;;  %v210_v29 = vperm.slane %v205_v26, 2  ;;  %v211_v30 = vperm.slane %v205_v26, 3 }
 0x12d   : > { %v231_v37 = vmul.f32 0.00390625, %v230_v36 }
 0x12e   : > { %212 = vst [vmem:[#allocation1] ss:$9 sm:$0xff] %v208_v27 }
 0x12f   : > { %214 = vst [vmem:[#allocation1 + $0x1] ss:$9 sm:$0xff] %v209_v28 }
 0x130   : > { %216 = vst [vmem:[#allocation1 + $0x2] ss:$9 sm:$0xff] %v210_v29 }
 0x131   : > { %218 = vst [vmem:[#allocation1 + $0x3] ss:$9 sm:$0xff] %v211_v30 }
 0x138   : > { %v219_v31 = vld [vmem:[#allocation1] sm:$0xff] }
 0x139   : > { %221 = vperm.xlu1 %417, %v219_v31  }
 0x1ab   : > { %v222_v32 = vpop.permute.xlu1 %221 }
 0x1ac   : > { %v223_v34 = vperm.slane %v222_v32, %v190_v21 }
 0x1ae   : > { %v225_v35 = vmax.f32 %v206_v33, %v223_v34 }
 0x1b0   : > { %226 = vst.msk [vmem:[#allocation3] sm:$0x1] %vm156_vm1, %v225_v35 }
 0x1b7   : > { %v419_v38 = vld [vmem:[#allocation3] ss:$0 sm:$0xff] }
 0x1b8   : > { %v237_v39 = vsel %vm236_vm2, %v231_v37, %v419_v38 }
 0x1b9   : > { %239 = vst.msk [vmem:[%s150_s22] sm:$0x3] %vm238_vm3, %v237_v39 }
 0x1ba   : > { %477 = shalt.err (!%p474_p13)
}
 0x1bb   : > { %354 = dma.vmem_to_hbm [thread:$0]  (%p598_p9), %s254_s23, 32, %s256_s24, %s241_s9  }
 0x1bc PF: > { %s267_s3 = sand.u32 1, %s512_s6   ;;  %p361_p0 = pnand %p340_p12, %p605_p11 }
 0x1bd   : > { %s268_s4 = scalar_lea.sflag [#allocation6], %s267_s3 }
 0x1be   : > { %p362_p1 = pneg %p361_p0 }
 0x1c0   : > { %507 = dma.done.wait (%p362_p1), %s268_s4, 32  }
 0x1c1   : > { %509 = vsyncadd (%p362_p1), %s268_s4, 4294967264  ;;  %s17_s11 = sadd.s32 1, %s532_s11   ;;  %s682_s6 = smov %s516_s7 }
 0x1c2   : > { %p14_p2 = scmp.ge.s32.totalorder %s17_s11, 4   ;;  %s683_s7 = smov %s520_s8 }
 0x1c3   : > { %s684_s8 = smov %s603_s20  ;;  %s685_s9 = smov %s528_s10 }
 0x1c4   : > { %s686_s10 = smov %s688_s14  ;;  %16 = sbr.rel (!%p14_p2) target bundleno = 6 (0x6), region = 83 }
 0x1c9   :  { %274 = vsyncpa [#allocation5], 1 }
 0x1ca   :  { %276 = vsyncpa [#allocation5 + $0x1], 1 }
 0x1cb   :  { %277 = vsyncpa [#allocation6], 1 }
 0x1cc   :  { %279 = vsyncpa [#allocation6 + $0x1], 1 }

</bundles_post_ra>
